<compile_context>
chip_gen: v7x
topology: tpu7x:2x2x1
jax: 0.10.0
libtpu: 0.0.40
codegen_flags: <defaults>
</compile_context>

<pallas_src>
import jax
import jax.numpy as jnp
from jax import lax
from jax.experimental import pallas as pl
from jax.experimental.pallas import tpu as pltpu


def _cdiv(a, b):
    return (a + b - 1) // b


def _chip_defaults():
    """(num_par, per-step combined input bytes, vmem limit) per TPU generation."""
    kind = ""
    try:
        kind = jax.devices()[0].device_kind.lower()
    except Exception:
        pass
    if "v7" in kind or "7x" in kind:
        # 2 TensorCores / ~3.2 TB/s HBM, but only 64 MiB physical VMEM.
        return 2, 6 * 1024 * 1024, 40 * 1024 * 1024
    # v5e / v6e: single TensorCore, 128 MiB physical VMEM.
    return 1, 4 * 1024 * 1024, 64 * 1024 * 1024


def _per_row_sums(x2d, y2d, *, num_par=None, step_bytes=None, vmem_limit=None):
    """Per-row (= per (b, c)) sums: intersect, sum_pred, sum_gt, bce_sum.

    x2d : (BC, S) raw logits, any float dtype (kept native; cast in-kernel).
    y2d : (BC, S) binary one-hot targets, any float/int/bool dtype (kept
          native; narrow dtypes reduce HBM traffic ~1.6x vs f32 targets).
    """
    d_par, d_step, d_vmem = _chip_defaults()
    num_par = d_par if num_par is None else num_par
    step_bytes = d_step if step_bytes is None else step_bytes
    vmem_limit = d_vmem if vmem_limit is None else vmem_limit

    BC, S = x2d.shape
    s128 = _cdiv(S, 128)

    # Zero-copy fast path needs S % 128 == 0 and at least 8 lane-rows.
    # Otherwise pad up (single HBM copy; only for unusual spatial sizes or
    # tiny inputs).  Logits pad with a large negative -> sigmoid == 0 and
    # BCE term == 0 exactly; targets pad with 0.  (Would need clamping for
    # fp8-range logit dtypes.)
    s128 = max(s128, 8)
    if s128 * 128 != S:
        pad = s128 * 128 - S
        x2d = jnp.pad(x2d, ((0, 0), (0, pad)), constant_values=-1e4)
        y2d = jnp.pad(y2d, ((0, 0), (0, pad)), constant_values=0)

    x3d = x2d.reshape(BC, s128, 128)   # free reshape (row-major last-dim split)
    y3d = y2d.reshape(BC, s128, 128)

    # ---------------- tiling -------------------------------------------------
    # bc blocks: whole BC when small, dense 8-sublane blocks otherwise.
    # NOTE: for BC > 8 not divisible by 8 the last bc block over-reads the bc
    # axis; those rows land in output rows >= BC and are sliced off below.
    bc_tile = BC if BC <= 8 else 8
    n_bc = _cdiv(BC, bc_tile)

    # Inner sub-block rows so the f32 temporaries stay vreg-resident.
    sub_nom = max(8, ((64 // bc_tile) // 8) * 8)

    isx = x2d.dtype.itemsize
    isy = y2d.dtype.itemsize
    min_is = min(isx, isy)
    sl_align = {4: 8, 2: 16, 1: 32}.get(min_is, 8)   # native sublane tile

    # Rows per grid step: stream >= ~1-2 MiB per input per step so the fixed
    # ~0.35 us per-grid-step overhead is amortized.
    tile_m = step_bytes // (bc_tile * 128 * (isx + isy))
    tile_m = max(8, min(tile_m, 4096))
    tile_m = min(tile_m, (s128 // 8) * 8)            # never exceed the row extent
    tile_m = max(8, (tile_m // 8) * 8)
    if tile_m >= sl_align:                           # narrow-dtype alignment
        tile_m = (tile_m // sl_align) * sl_align

    sub = sub_nom
    while tile_m % sub != 0:
        sub //= 2
    sub = max(sub, 8)
    if sl_align > sub and tile_m % sl_align == 0:
        sub = sl_align                               # aligned inner slices
    n_sub = tile_m // sub

    n_blocks = _cdiv(s128, tile_m)
    num_par = max(1, min(num_par, n_blocks))
    n_steps = _cdiv(n_blocks, num_par)
    g_full = s128 // tile_m                          # fully-valid blocks
    needs_mask = (num_par * n_steps * tile_m) != s128

    # ---------------- kernel -------------------------------------------------
    def kernel(x_ref, y_ref, out_ref, acc_ref):
        s = pl.program_id(2)

        @pl.when(s == 0)
        def _():
            acc_ref[...] = jnp.zeros_like(acc_ref)

        g = pl.program_id(0) * n_steps + s           # global block index

        def accumulate(valid_rows):
            def body(j, carry):
                i_p, sp_p, sg_p, ce_p = carry
                r0 = j * sub
                if not isinstance(r0, int):
                    r0 = pl.multiple_of(r0, sub)
                x = x_ref[:, pl.ds(r0, sub), :].astype(jnp.float32)
                y = y_ref[:, pl.ds(r0, sub), :]
                y_nz = y != 0                        # targets are binary one-hot
                xn = -x
                e = jnp.exp(jnp.minimum(x, xn))      # exp(-|x|)
                rcp = pl.reciprocal(1.0 + e, approx=True)
                sig = jnp.where(x >= 0.0, rcp, e * rcp)      # sigmoid(x)
                # BCEWithLogits, stable: max(x,0) - x*y + log1p(exp(-|x|));
                # binary y  =>  max(x,0) - x*y == relu(-x) if y else relu(x).
                ce = jnp.where(y_nz, jnp.maximum(xn, 0.0),
                               jnp.maximum(x, 0.0)) + jnp.log1p(e)
                y_f = jnp.where(y_nz, 1.0, 0.0)
                inter = jnp.where(y_nz, sig, 0.0)
                if valid_rows is not None:           # partial / over-run block
                    row = lax.broadcasted_iota(jnp.int32, (1, sub, 1), 1) + r0
                    m = row < valid_rows
                    inter = jnp.where(m, inter, 0.0)
                    sig = jnp.where(m, sig, 0.0)
                    y_f = jnp.where(m, y_f, 0.0)
                    ce = jnp.where(m, ce, 0.0)
                return (i_p + jnp.sum(inter, axis=1),
                        sp_p + jnp.sum(sig, axis=1),
                        sg_p + jnp.sum(y_f, axis=1),
                        ce_p + jnp.sum(ce, axis=1))

            z = jnp.zeros((bc_tile, 128), jnp.float32)
            init = (z, z, z, z)
            if n_sub == 1:
                i_p, sp_p, sg_p, ce_p = body(0, init)
            else:
                i_p, sp_p, sg_p, ce_p = lax.fori_loop(0, n_sub, body, init)
            acc_ref[0] += i_p
            acc_ref[1] += sp_p
            acc_ref[2] += sg_p
            acc_ref[3] += ce_p

        if not needs_mask:
            accumulate(None)
        else:
            @pl.when(g < g_full)
            def _():
                accumulate(None)

            @pl.when(g >= g_full)
            def _():
                accumulate(s128 - g * tile_m)

        @pl.when(s == n_steps - 1)
        def _():
            out_ref[0] = acc_ref[...]

    in_spec = pl.BlockSpec(
        (bc_tile, tile_m, 128),
        lambda p, b, s: (b, jnp.minimum(p * n_steps + s, n_blocks - 1), 0))
    out_spec = pl.BlockSpec((1, 4, bc_tile, 128), lambda p, b, s: (p, 0, b, 0))

    out = pl.pallas_call(
        kernel,
        out_shape=jax.ShapeDtypeStruct((num_par, 4, n_bc * bc_tile, 128),
                                       jnp.float32),
        grid_spec=pltpu.PrefetchScalarGridSpec(
            num_scalar_prefetch=0,
            grid=(num_par, n_bc, n_steps),
            in_specs=[in_spec, in_spec],
            out_specs=out_spec,
            scratch_shapes=[pltpu.VMEM((4, bc_tile, 128), jnp.float32)],
        ),
        compiler_params=pltpu.CompilerParams(
            dimension_semantics=("parallel", "arbitrary", "arbitrary"),
            vmem_limit_bytes=vmem_limit,
        ),
    )(x3d, y3d)

    sums = out.sum(axis=(0, 3))[:, :BC]   # reduce parallel chunks + lanes -> (4, BC)
    return sums[0], sums[1], sums[2], sums[3]


def dc_and_bce_loss(net_output, target, *, weight_ce=1.0, weight_dice=1.0,
                    batch_dice=False, do_bg=True, smooth=1.0,
                    num_par=None, step_bytes=None, vmem_limit=None):
    """Forward of DC_and_BCE_loss (use_ignore_label=False, the default).

    net_output : (B, C, *spatial) raw logits (DO NOT apply a nonlinearity).
    target     : (B, C, *spatial) binary one-hot region encoding; narrow
                 dtypes (bool / uint8 / bf16) are supported and preferred —
                 do NOT cast to f32 right before calling (extra HBM pass).
    """
    # TODO(synk): use_ignore_label=True path (mask from target[:, -1:], masked
    # BCE and masked dice sums) not implemented.
    B, C = net_output.shape[0], net_output.shape[1]
    S = 1
    for d in net_output.shape[2:]:
        S *= d

    x2d = net_output.reshape(B * C, S)
    y2d = target.reshape(B * C, S)

    inter, spred, sgt, bce_sum = _per_row_sums(
        x2d, y2d, num_par=num_par, step_bytes=step_bytes, vmem_limit=vmem_limit)
    inter = inter.reshape(B, C)
    spred = spred.reshape(B, C)
    sgt = sgt.reshape(B, C)

    if not do_bg:
        inter, spred, sgt = inter[:, 1:], spred[:, 1:], sgt[:, 1:]

    if batch_dice:
        inter = inter.sum(0)
        spred = spred.sum(0)
        sgt = sgt.sum(0)

    dc = (2.0 * inter + smooth) / jnp.clip(sgt + spred + smooth, 1e-8)
    dc_loss = -jnp.mean(dc)

    # BCEWithLogitsLoss(reduction='mean') over all B*C*S (real) elements.
    ce_loss = jnp.sum(bce_sum) / (B * C * S)

    return weight_ce * ce_loss + weight_dice * dc_loss


def _reference_loss(x, y, *, weight_ce=1.0, weight_dice=1.0,
                    batch_dice=False, do_bg=True, smooth=1.0):
    """Pure-JAX reference mirroring the PyTorch module, for verification."""
    x = x.astype(jnp.float32)
    y = y.astype(jnp.float32)
    axes = tuple(range(2, x.ndim))
    xs = jax.nn.sigmoid(x)
    inter = jnp.sum(xs * y, axis=axes)
    spred = jnp.sum(xs, axis=axes)
    sgt = jnp.sum(y, axis=axes)
    if not do_bg:
        inter, spred, sgt = inter[:, 1:], spred[:, 1:], sgt[:, 1:]
    if batch_dice:
        inter, spred, sgt = inter.sum(0), spred.sum(0), sgt.sum(0)
    dc = (2.0 * inter + smooth) / jnp.clip(sgt + spred + smooth, 1e-8)
    dc_loss = -jnp.mean(dc)
    bce = jnp.maximum(x, 0.0) - x * y + jnp.log1p(jnp.exp(-jnp.abs(x)))
    ce_loss = jnp.mean(bce)
    return weight_ce * ce_loss + weight_dice * dc_loss


if __name__ == "__main__":
    key = jax.random.PRNGKey(0)
    ks = jax.random.split(key, 10)

    def check(x, y, tol=5e-3, **kw):
        got = jax.block_until_ready(dc_and_bce_loss(x, y, **kw))
        ref = jax.block_until_ready(_reference_loss(x, y))
        assert jnp.allclose(got, ref, rtol=tol, atol=tol), (got, ref)

    # 1) Canonical small shape (B=2, C=4, 16x16) -> tiny-S pad path.
    x = jax.random.normal(ks[0], (2, 4, 16, 16), dtype=jnp.float32)
    y = jax.random.bernoulli(ks[1], 0.3, (2, 4, 16, 16)).astype(jnp.float32)
    check(x, y)

    # 2) Odd spatial size (7x19) -> S % 128 != 0 fallback pad path.
    x = jax.random.normal(ks[2], (1, 3, 7, 19), dtype=jnp.float32)
    y = jax.random.bernoulli(ks[3], 0.4, (1, 3, 7, 19)).astype(jnp.float32)
    check(x, y)

    # 3) Zero-copy path: multi-step reduction + in-kernel masked final block.
    x = jax.random.normal(ks[4], (2, 2, 48, 48), dtype=jnp.float32)
    y = jax.random.bernoulli(ks[5], 0.35, (2, 2, 48, 48)).astype(jnp.float32)
    check(x, y)

    # 4) Narrow (uint8) targets + explicit parallel grid axis + masking.
    x = jax.random.normal(ks[6], (2, 2, 80, 80), dtype=jnp.float32)
    y = jax.random.bernoulli(ks[7], 0.25, (2, 2, 80, 80)).astype(jnp.uint8)
    check(x, y, num_par=2)

    # 5) Inner sub-block (fori_loop, n_sub > 1) path, zero-copy, no masking.
    x = jax.random.normal(ks[8], (2, 4, 64, 64), dtype=jnp.float32)
    y = jax.random.bernoulli(ks[9], 0.3, (2, 4, 64, 64)).astype(jnp.float32)
    check(x, y)

    print("KERNEL_OK")
</pallas_src>

<mosaic_0001>
module attributes {stable_mosaic.version = 11 : i64} {
  func.func @kernel(%arg0: i32, %arg1: i32, %arg2: i32, %arg3: memref<8x8x128xf32, #tpu.memory_space<vmem>>, %arg4: memref<8x8x128xf32, #tpu.memory_space<vmem>>, %arg5: memref<1x4x8x128xf32, #tpu.memory_space<vmem>>, %arg6: memref<4x8x128xf32, #tpu.memory_space<vmem>>) attributes {dimension_semantics = [#tpu.dimension_semantics<parallel>, #tpu.dimension_semantics<arbitrary>, #tpu.dimension_semantics<arbitrary>], iteration_bounds = array<i64: 1, 1, 1>, scalar_prefetch = 0 : i64, scratch_operands = 1 : i64, tpu.core_type = #tpu.core_type<tc>, window_params = [{transform_indices = @transform_0, window_bounds = array<i64: 8, 8, 128>}, {transform_indices = @transform_1, window_bounds = array<i64: 8, 8, 128>}, {transform_indices = @transform_2, window_bounds = array<i64: 1, 4, 8, 128>}]} {
    %c0_i32 = arith.constant 0 : i32
    %0 = arith.cmpi eq, %arg2, %c0_i32 : i32
    %1 = arith.extui %0 : i1 to i32
    %c0_i32_0 = arith.constant 0 : i32
    %2 = arith.cmpi ne, %1, %c0_i32_0 : i32
    scf.if %2 {
      %cst_42 = arith.constant 0.000000e+00 : f32
      %66 = vector.broadcast %cst_42 : f32 to vector<4x8x128xf32>
      %c0_43 = arith.constant 0 : index
      %c0_44 = arith.constant 0 : index
      %c0_45 = arith.constant 0 : index
      %67 = vector.load %arg6[%c0_43, %c0_44, %c0_45] : memref<4x8x128xf32, #tpu.memory_space<vmem>>, vector<4x8x128xf32>
      tpu.vector_store %arg6[%c0_43, %c0_44, %c0_45], %66 {strides = array<i32>} : memref<4x8x128xf32, #tpu.memory_space<vmem>>, vector<4x8x128xf32>,
    } else {
    }
    %cst = arith.constant 0.000000e+00 : f32
    %3 = vector.broadcast %cst : f32 to vector<8x128xf32>
    %c0 = arith.constant 0 : index
    %c0_1 = arith.constant 0 : index
    %c0_2 = arith.constant 0 : index
    %4 = vector.load %arg3[%c0, %c0_1, %c0_2] : memref<8x8x128xf32, #tpu.memory_space<vmem>>, vector<8x8x128xf32>
    %c0_3 = arith.constant 0 : index
    %c0_4 = arith.constant 0 : index
    %c0_5 = arith.constant 0 : index
    %5 = vector.load %arg4[%c0_3, %c0_4, %c0_5] : memref<8x8x128xf32, #tpu.memory_space<vmem>>, vector<8x8x128xf32>
    %cst_6 = arith.constant 0.000000e+00 : f32
    %6 = vector.broadcast %cst_6 : f32 to vector<8x8x128xf32>
    %7 = arith.cmpf one, %5, %6 : vector<8x8x128xf32>
    %cst_7 = arith.constant 0.000000e+00 : f32
    %8 = vector.broadcast %cst_7 : f32 to vector<8x8x128xf32>
    %9 = arith.subf %8, %4 : vector<8x8x128xf32>
    %10 = arith.minimumf %4, %9 : vector<8x8x128xf32>
    %11 = math.exp %10 : vector<8x8x128xf32>
    %cst_8 = arith.constant 1.000000e+00 : f32
    %12 = vector.broadcast %cst_8 : f32 to vector<8x8x128xf32>
    %13 = arith.addf %12, %11 : vector<8x8x128xf32>
    %14 = tpu.reciprocal %13 {approx = true} : vector<8x8x128xf32> -> vector<8x8x128xf32>
    %cst_9 = arith.constant 0.000000e+00 : f32
    %15 = vector.broadcast %cst_9 : f32 to vector<8x8x128xf32>
    %16 = arith.cmpf oge, %4, %15 : vector<8x8x128xf32>
    %17 = arith.mulf %11, %14 : vector<8x8x128xf32>
    %18 = arith.select %16, %14, %17 : vector<8x8x128xi1>, vector<8x8x128xf32>
    %cst_10 = arith.constant 0.000000e+00 : f32
    %19 = vector.broadcast %cst_10 : f32 to vector<8x8x128xf32>
    %20 = arith.maximumf %9, %19 : vector<8x8x128xf32>
    %cst_11 = arith.constant 0.000000e+00 : f32
    %21 = vector.broadcast %cst_11 : f32 to vector<8x8x128xf32>
    %22 = arith.maximumf %4, %21 : vector<8x8x128xf32>
    %23 = arith.select %7, %20, %22 : vector<8x8x128xi1>, vector<8x8x128xf32>
    %24 = math.log1p %11 : vector<8x8x128xf32>
    %25 = arith.addf %23, %24 : vector<8x8x128xf32>
    %cst_12 = arith.constant 1.000000e+00 : f32
    %cst_13 = arith.constant 0.000000e+00 : f32
    %26 = vector.broadcast %cst_12 : f32 to vector<8x8x128xf32>
    %27 = vector.broadcast %cst_13 : f32 to vector<8x8x128xf32>
    %28 = arith.select %7, %26, %27 : vector<8x8x128xi1>, vector<8x8x128xf32>
    %cst_14 = arith.constant 0.000000e+00 : f32
    %29 = vector.broadcast %cst_14 : f32 to vector<8x8x128xf32>
    %30 = arith.select %7, %18, %29 : vector<8x8x128xi1>, vector<8x8x128xf32>
    %cst_15 = arith.constant dense<0.000000e+00> : vector<8x128xf32>
    %31 = vector.multi_reduction <add>, %30, %cst_15 [1] : vector<8x8x128xf32> to vector<8x128xf32>
    %32 = arith.addf %3, %31 : vector<8x128xf32>
    %cst_16 = arith.constant dense<0.000000e+00> : vector<8x128xf32>
    %33 = vector.multi_reduction <add>, %18, %cst_16 [1] : vector<8x8x128xf32> to vector<8x128xf32>
    %34 = arith.addf %3, %33 : vector<8x128xf32>
    %cst_17 = arith.constant dense<0.000000e+00> : vector<8x128xf32>
    %35 = vector.multi_reduction <add>, %28, %cst_17 [1] : vector<8x8x128xf32> to vector<8x128xf32>
    %36 = arith.addf %3, %35 : vector<8x128xf32>
    %cst_18 = arith.constant dense<0.000000e+00> : vector<8x128xf32>
    %37 = vector.multi_reduction <add>, %25, %cst_18 [1] : vector<8x8x128xf32> to vector<8x128xf32>
    %38 = arith.addf %3, %37 : vector<8x128xf32>
    %c0_19 = arith.constant 0 : index
    %c0_20 = arith.constant 0 : index
    %c0_21 = arith.constant 0 : index
    %39 = vector.load %arg6[%c0_19, %c0_20, %c0_21] : memref<4x8x128xf32, #tpu.memory_space<vmem>>, vector<1x8x128xf32>
    %40 = vector.shape_cast %39 : vector<1x8x128xf32> to vector<8x128xf32>
    %41 = arith.addf %40, %32 : vector<8x128xf32>
    %c0_22 = arith.constant 0 : index
    %c0_23 = arith.constant 0 : index
    %c0_24 = arith.constant 0 : index
    %42 = vector.load %arg6[%c0_22, %c0_23, %c0_24] : memref<4x8x128xf32, #tpu.memory_space<vmem>>, vector<1x8x128xf32>
    %43 = vector.shape_cast %42 : vector<1x8x128xf32> to vector<8x128xf32>
    %44 = vector.shape_cast %41 : vector<8x128xf32> to vector<1x8x128xf32>
    tpu.vector_store %arg6[%c0_22, %c0_23, %c0_24], %44 {strides = array<i32>} : memref<4x8x128xf32, #tpu.memory_space<vmem>>, vector<1x8x128xf32>,
    %c1 = arith.constant 1 : index
    %c0_25 = arith.constant 0 : index
    %c0_26 = arith.constant 0 : index
    %45 = vector.load %arg6[%c1, %c0_25, %c0_26] : memref<4x8x128xf32, #tpu.memory_space<vmem>>, vector<1x8x128xf32>
    %46 = vector.shape_cast %45 : vector<1x8x128xf32> to vector<8x128xf32>
    %47 = arith.addf %46, %34 : vector<8x128xf32>
    %c1_27 = arith.constant 1 : index
    %c0_28 = arith.constant 0 : index
    %c0_29 = arith.constant 0 : index
    %48 = vector.load %arg6[%c1_27, %c0_28, %c0_29] : memref<4x8x128xf32, #tpu.memory_space<vmem>>, vector<1x8x128xf32>
    %49 = vector.shape_cast %48 : vector<1x8x128xf32> to vector<8x128xf32>
    %50 = vector.shape_cast %47 : vector<8x128xf32> to vector<1x8x128xf32>
    tpu.vector_store %arg6[%c1_27, %c0_28, %c0_29], %50 {strides = array<i32>} : memref<4x8x128xf32, #tpu.memory_space<vmem>>, vector<1x8x128xf32>,
    %c2 = arith.constant 2 : index
    %c0_30 = arith.constant 0 : index
    %c0_31 = arith.constant 0 : index
    %51 = vector.load %arg6[%c2, %c0_30, %c0_31] : memref<4x8x128xf32, #tpu.memory_space<vmem>>, vector<1x8x128xf32>
    %52 = vector.shape_cast %51 : vector<1x8x128xf32> to vector<8x128xf32>
    %53 = arith.addf %52, %36 : vector<8x128xf32>
    %c2_32 = arith.constant 2 : index
    %c0_33 = arith.constant 0 : index
    %c0_34 = arith.constant 0 : index
    %54 = vector.load %arg6[%c2_32, %c0_33, %c0_34] : memref<4x8x128xf32, #tpu.memory_space<vmem>>, vector<1x8x128xf32>
    %55 = vector.shape_cast %54 : vector<1x8x128xf32> to vector<8x128xf32>
    %56 = vector.shape_cast %53 : vector<8x128xf32> to vector<1x8x128xf32>
    tpu.vector_store %arg6[%c2_32, %c0_33, %c0_34], %56 {strides = array<i32>} : memref<4x8x128xf32, #tpu.memory_space<vmem>>, vector<1x8x128xf32>,
    %c3 = arith.constant 3 : index
    %c0_35 = arith.constant 0 : index
    %c0_36 = arith.constant 0 : index
    %57 = vector.load %arg6[%c3, %c0_35, %c0_36] : memref<4x8x128xf32, #tpu.memory_space<vmem>>, vector<1x8x128xf32>
    %58 = vector.shape_cast %57 : vector<1x8x128xf32> to vector<8x128xf32>
    %59 = arith.addf %58, %38 : vector<8x128xf32>
    %c3_37 = arith.constant 3 : index
    %c0_38 = arith.constant 0 : index
    %c0_39 = arith.constant 0 : index
    %60 = vector.load %arg6[%c3_37, %c0_38, %c0_39] : memref<4x8x128xf32, #tpu.memory_space<vmem>>, vector<1x8x128xf32>
    %61 = vector.shape_cast %60 : vector<1x8x128xf32> to vector<8x128xf32>
    %62 = vector.shape_cast %59 : vector<8x128xf32> to vector<1x8x128xf32>
    tpu.vector_store %arg6[%c3_37, %c0_38, %c0_39], %62 {strides = array<i32>} : memref<4x8x128xf32, #tpu.memory_space<vmem>>, vector<1x8x128xf32>,
    %c0_i32_40 = arith.constant 0 : i32
    %63 = arith.cmpi eq, %arg2, %c0_i32_40 : i32
    %64 = arith.extui %63 : i1 to i32
    %c0_i32_41 = arith.constant 0 : i32
    %65 = arith.cmpi ne, %64, %c0_i32_41 : i32
    scf.if %65 {
      %c0_42 = arith.constant 0 : index
      %c0_43 = arith.constant 0 : index
      %c0_44 = arith.constant 0 : index
      %66 = vector.load %arg6[%c0_42, %c0_43, %c0_44] : memref<4x8x128xf32, #tpu.memory_space<vmem>>, vector<4x8x128xf32>
      %c0_45 = arith.constant 0 : index
      %c0_46 = arith.constant 0 : index
      %c0_47 = arith.constant 0 : index
      %c0_48 = arith.constant 0 : index
      %67 = vector.load %arg5[%c0_45, %c0_46, %c0_47, %c0_48] : memref<1x4x8x128xf32, #tpu.memory_space<vmem>>, vector<1x4x8x128xf32>
      %68 = vector.shape_cast %67 : vector<1x4x8x128xf32> to vector<4x8x128xf32>
      %69 = vector.shape_cast %66 : vector<4x8x128xf32> to vector<1x4x8x128xf32>
      tpu.vector_store %arg5[%c0_45, %c0_46, %c0_47, %c0_48], %69 {strides = array<i32>} : memref<1x4x8x128xf32, #tpu.memory_space<vmem>>, vector<1x4x8x128xf32>,
    } else {
    }
    return
  }
  func.func @transform_0(%arg0: i32, %arg1: i32, %arg2: i32) -> (i32, i32, i32) {
    %c1_i32 = arith.constant 1 : i32
    %0 = arith.muli %arg0, %c1_i32 : i32
    %1 = arith.addi %0, %arg2 : i32
    %c0_i32 = arith.constant 0 : i32
    %2 = arith.minsi %1, %c0_i32 : i32
    %c0_i32_0 = arith.constant 0 : i32
    %c0_i32_1 = arith.constant 0 : i32
    return %arg1, %2, %c0_i32_0 : i32, i32, i32
  }
  func.func @transform_1(%arg0: i32, %arg1: i32, %arg2: i32) -> (i32, i32, i32) {
    %c1_i32 = arith.constant 1 : i32
    %0 = arith.muli %arg0, %c1_i32 : i32
    %1 = arith.addi %0, %arg2 : i32
    %c0_i32 = arith.constant 0 : i32
    %2 = arith.minsi %1, %c0_i32 : i32
    %c0_i32_0 = arith.constant 0 : i32
    %c0_i32_1 = arith.constant 0 : i32
    return %arg1, %2, %c0_i32_0 : i32, i32, i32
  }
  func.func @transform_2(%arg0: i32, %arg1: i32, %arg2: i32) -> (i32, i32, i32, i32) {
    %c0_i32 = arith.constant 0 : i32
    %c0_i32_0 = arith.constant 0 : i32
    %c0_i32_1 = arith.constant 0 : i32
    return %arg0, %c0_i32, %arg1, %c0_i32_0 : i32, i32, i32, i32
  }
}

</mosaic_0001>

<bundles_post_ra>
// kernel: tpu_custom_call.1
= control target key start
LH: loop header
LB: loop body
LE: loop exit
PB: predicated region body
PF: predicated region fallthrough
CT: control target
= control target key end

     0   :  { %7 = vsyncpa [#allocation4], 0  ;;  %s1312_s0 = inlined_call_operand.hbm [shape: f32[8,8,128], index: 0, kind: input, shape index: {}]   ;;  %s1313_s1 = inlined_call_operand.hbm [shape: f32[8,8,128], index: 1, kind: input, shape index: {}]   ;;  %s1314_s2 = inlined_call_operand.hbm [shape: f32[1,4,8,128], index: 2, kind: output, shape index: {}]  }
   0x1   :  { %8 = vsyncpa [#allocation7], 0 }
   0x2   :  { %9 = vsyncpa [#allocation5], 0  ;;  %s749_s9 = smov [#allocation3]   ;;  %s677_s13 = scalar_lea.hbm %s1312_s0, 1024 }
   0x3   :  { %s20_s10 = sshll.u32 %s749_s9, 4  ;;  %p678_p0 = scmp.ne.s32.totalorder %s1312_s0, %s677_s13  ;;  %s21_s10 = int_to_ptr.vmem [resolvable:$true] %s20_s10 }
   0x4   :  { %p681_p1 = scmp.lt.u32.totalorder %s677_s13, %s1312_s0 }
   0x6   :  { %p683_p2 = pnand %p681_p1, %p678_p0 }
   0x8   :  { %686 = shalt.err (!%p683_p2)
}
   0x9   :  { %s687_s18 = scalar_lea.vmem %s21_s10, 1024  ;;  %p692_p4 = scmp.lt.s32.totalorder %s21_s10, %s21_s10 }
   0xa   :  { %p688_p3 = scmp.ne.s32.totalorder %s21_s10, %s687_s18  ;;  %p693_p5 = scmp.lt.s32.totalorder %s687_s18, %s687_s18 }
   0xc   :  { %p694_p6 = por %p693_p5, %p692_p4 }
   0xe   :  { %p695_p7 = pnand %p694_p6, %p688_p3 }
  0x10   :  { %698 = shalt.err (!%p695_p7)
}
  0x11   :  { %s750_s19 = smov 128   ;;  %s751_s20 = smov 8  }
  0x12   :  { %26 = dma.hbm_to_vmem [thread:$0]  %s1312_s0, 1024, %s21_s10, [#allocation4], %s750_s19, %s750_s19, %s751_s20  }
  0x13   :  { %s752_s23 = smov [#allocation6]   ;;  %s699_s27 = scalar_lea.hbm %s1313_s1, 1024 }
  0x14   :  { %s37_s24 = sshll.u32 %s752_s23, 4  ;;  %p700_p8 = scmp.ne.s32.totalorder %s1313_s1, %s699_s27  ;;  %s38_s24 = int_to_ptr.vmem [resolvable:$true] %s37_s24 }
  0x15   :  { %p703_p9 = scmp.lt.u32.totalorder %s699_s27, %s1313_s1 }
  0x17   :  { %p705_p10 = pnand %p703_p9, %p700_p8 }
  0x19   :  { %708 = shalt.err (!%p705_p10)
}
  0x1a   :  { %s709_s4 = scalar_lea.vmem %s38_s24, 1024  ;;  %p714_p12 = scmp.lt.s32.totalorder %s38_s24, %s38_s24 }
  0x1b   :  { %p710_p11 = scmp.ne.s32.totalorder %s38_s24, %s709_s4  ;;  %p715_p13 = scmp.lt.s32.totalorder %s709_s4, %s709_s4 }
  0x1d   :  { %p716_p0 = por %p715_p13, %p714_p12 }
  0x1f   :  { %p717_p1 = pnand %p716_p0, %p710_p11 }
  0x21   :  { %720 = shalt.err (!%p717_p1)
}
  0x22   :  { %43 = dma.hbm_to_vmem [thread:$0]  %s1313_s1, 1024, %s38_s24, [#allocation7], %s750_s19, %s750_s19, %s751_s20  }
  0x23   :  { %743 = dma.done.wait [#allocation4], 1024  }
  0x24   :  { %744 = vsyncadd [#allocation4], 4294966272 }
  0x25   :  { %745 = dma.done.wait [#allocation7], 1024  }
  0x26   :  { %746 = vsyncadd [#allocation7], 4294966272  ;;  %v800_v0 = vld [vmem:[#allocation3] sm:$0xff]  ;;  %v802_v1 = vld [vmem:[#allocation3 + $0x8] sm:$0xff]  ;;  %s754_s1 = smov [#allocation8]  }
  0x27   :  { %v804_v2 = vld [vmem:[#allocation3 + $0x10] sm:$0xff]  ;;  %v806_v3 = vld [vmem:[#allocation3 + $0x18] sm:$0xff]  ;;  %v808_v4 = vld [vmem:[#allocation3 + $0x20] sm:$0xff]  ;;  %v88_v6 = vsub.f32 0.0, %v800_v0  ;;  %v89_v7 = vsub.f32 0.0, %v802_v1  ;;  %v168_v43 = vmax.f32 %v800_v0, 0.0 }
  0x28   :  { %v810_v5 = vld [vmem:[#allocation3 + $0x28] sm:$0xff]  ;;  %v90_v8 = vsub.f32 0.0, %v804_v2  ;;  %v815_v9 = vld [vmem:[#allocation3 + $0x30] sm:$0xff]  ;;  %v817_v10 = vld [vmem:[#allocation3 + $0x38] sm:$0xff]  ;;  %v91_v11 = vsub.f32 0.0, %v806_v3  ;;  %v92_v12 = vsub.f32 0.0, %v808_v4 }
  0x29   :  { %v93_v13 = vsub.f32 0.0, %v810_v5  ;;  %v94_v14 = vsub.f32 0.0, %v815_v9  ;;  %v96_v15 = vmin.f32 %v800_v0, %v88_v6  ;;  %v95_v16 = vsub.f32 0.0, %v817_v10  ;;  %v832_v28 = vld [vmem:[#allocation6] sm:$0xff]  ;;  %v834_v30 = vld [vmem:[#allocation6 + $0x8] sm:$0xff]  ;;  %v836_v31 = vld [vmem:[#allocation6 + $0x10] sm:$0xff] }
  0x2a   :  { %v97_v17 = vmin.f32 %v802_v1, %v89_v7  ;;  %v98_v18 = vmin.f32 %v804_v2, %v90_v8  ;;  %v99_v19 = vmin.f32 %v806_v3, %v91_v11  ;;  %v100_v20 = vmin.f32 %v808_v4, %v92_v12  ;;  %v838_v32 = vld [vmem:[#allocation6 + $0x18] sm:$0xff]  ;;  %v840_v34 = vld [vmem:[#allocation6 + $0x20] sm:$0xff]  ;;  %v846_v37 = vld [vmem:[#allocation6 + $0x28] sm:$0xff]  ;;  %s606_s6 = sshll.u32 %s754_s1, 4  ;;  %s607_s6 = int_to_ptr.vmem [resolvable:$true] %s606_s6 }
  0x2b   :  { %v101_v21 = vmin.f32 %v810_v5, %v93_v13  ;;  %v102_v22 = vmin.f32 %v815_v9, %v94_v14  ;;  %v104_v23 = vmul.f32 1.442695, %v96_v15  ;;  %v103_v25 = vmin.f32 %v817_v10, %v95_v16  ;;  %v848_v38 = vld [vmem:[#allocation6 + $0x30] sm:$0xff]  ;;  %v852_v44 = vld [vmem:[#allocation6 + $0x38] sm:$0xff]  ;;  %s721_s7 = scalar_lea.vmem %s607_s6, 512  ;;  %p726_p3 = scmp.lt.s32.totalorder %s607_s6, %s607_s6 }
  0x2c   :  { %v106_v24 = vmul.f32 1.442695, %v97_v17  ;;  %v108_v26 = vmul.f32 1.442695, %v98_v18  ;;  %v110_v27 = vmul.f32 1.442695, %v99_v19  ;;  %p722_p2 = scmp.ne.s32.totalorder %s607_s6, %s721_s7  ;;  %p727_p4 = scmp.lt.s32.totalorder %s721_s7, %s721_s7 }
  0x2d   :  { %629 = vpow2.f32 %v104_v23  ;;  %v112_v29 = vmul.f32 1.442695, %v100_v20  ;;  %v114_v33 = vmul.f32 1.442695, %v101_v21  ;;  %v116_v35 = vmul.f32 1.442695, %v102_v22 }
  0x2e   :  { %631 = vpow2.f32 %v106_v24  ;;  %vm1317_vm0 = vcmp.ne.f32.partialorder %v832_v28, 0.0  ;;  %v118_v36 = vmul.f32 1.442695, %v103_v25  ;;  %vm1316_vm1 = vcmp.ne.f32.partialorder %v834_v30, 0.0  ;;  %p728_p5 = por %p727_p4, %p726_p3 }
  0x2f   :  { %633 = vpow2.f32 %v108_v26  ;;  %vm1315_vm2 = vcmp.ne.f32.partialorder %v836_v31, 0.0  ;;  %vm83_vm3 = vcmp.ne.f32.partialorder %v838_v32, 0.0  ;;  %vm84_vm4 = vcmp.ne.f32.partialorder %v840_v34, 0.0 }
  0x30   :  { %635 = vpow2.f32 %v110_v27  ;;  %v160_v39 = vmax.f32 %v88_v6, 0.0  ;;  %v161_v40 = vmax.f32 %v89_v7, 0.0  ;;  %v162_v41 = vmax.f32 %v90_v8, 0.0  ;;  %p729_p6 = pnand %p728_p5, %p722_p2 }
  0x31   :  { %637 = vpow2.f32 %v112_v29  ;;  %v163_v42 = vmax.f32 %v91_v11, 0.0  ;;  %v169_v45 = vmax.f32 %v802_v1, 0.0  ;;  %v170_v46 = vmax.f32 %v804_v2, 0.0 }
  0x32   :  { %639 = vpow2.f32 %v114_v33  ;;  %v171_v47 = vmax.f32 %v806_v3, 0.0  ;;  %vm85_vm5 = vcmp.ne.f32.partialorder %v846_v37, 0.0  ;;  %vm86_vm6 = vcmp.ne.f32.partialorder %v848_v38, 0.0 }
  0x33   :  { %641 = vpow2.f32 %v116_v35  ;;  %v164_v48 = vmax.f32 %v92_v12, 0.0  ;;  %v172_v49 = vmax.f32 %v808_v4, 0.0  ;;  %v165_v50 = vmax.f32 %v93_v13, 0.0 }
  0x34   :  { %643 = vpow2.f32 %v118_v36  ;;  %v166_v51 = vmax.f32 %v94_v14, 0.0  ;;  %v173_v52 = vmax.f32 %v810_v5, 0.0  ;;  %v174_v53 = vmax.f32 %v815_v9, 0.0 }
  0x35   :  { %vm1320_vm7 = vcmp.ne.f32.partialorder %v852_v44, 0.0  ;;  %v167_v55 = vmax.f32 %v95_v16, 0.0  ;;  %v175_v56 = vmax.f32 %v817_v10, 0.0  ;;  %v868_v57 = vsel %vm1317_vm0, %v160_v39, %v168_v43 }
  0x36   :  { %v875_v60 = vsel %vm1316_vm1, %v161_v40, %v169_v45  ;;  %v879_v61 = vsel %vm1315_vm2, %v162_v41, %v170_v46  ;;  %v883_v62 = vsel %vm83_vm3, %v163_v42, %v171_v47  ;;  %v890_v7 = vsel %vm84_vm4, %v164_v48, %v172_v49 }
  0x37   :  { %v862_v54 = vpop.eup %629  ;;  %v899_v14 = vsel %vm85_vm5, %v165_v50, %v173_v52  ;;  %v903_v15 = vsel %vm86_vm6, %v166_v51, %v174_v53  ;;  %v910_v18 = vsel %vm1320_vm7, %v167_v55, %v175_v56  ;;  %v1318_v19 = vmov 0.0  }
  0x38   :  { %v870_v58 = vpop.eup %631  ;;  %v120_v59 = vadd.f32 1.0, %v862_v54  ;;  %v187_v8 = vmul.f32 -0.5, %v862_v54  ;;  %v915_v20 = vsel %vm1317_vm0, 1.0, %v1318_v19  ;;  %vm136_vm8 = vcmp.ge.f32.partialorder %v800_v0, 0.0 }
  0x39   :  { %v885_v63 = vpop.eup %633  ;;  %v121_v6 = vadd.f32 1.0, %v870_v58  ;;  %v196_v11 = vmul.f32 -0.5, %v870_v58  ;;  %v190_v23 = vand.u32 2147483647, %v862_v54  ;;  %vm137_vm9 = vcmp.ge.f32.partialorder %v802_v1, 0.0 }
  0x3a   :  { %v894_v12 = vpop.eup %635  ;;  %v122_v13 = vadd.f32 1.0, %v885_v63  ;;  %645 = vrcp.f32 %v120_v59  ;;  %v205_v24 = vmul.f32 -0.5, %v885_v63  ;;  %v188_v27 = vadd.f32 1.0, %v187_v8 }
  0x3b   :  { %v905_v16 = vpop.eup %637  ;;  %v123_v17 = vadd.f32 1.0, %v894_v12  ;;  %647 = vrcp.f32 %v121_v6  ;;  %v197_v29 = vadd.f32 1.0, %v196_v11  ;;  %v214_v36 = vmul.f32 -0.5, %v894_v12 }
  0x3c   :  { %v917_v21 = vpop.eup %639  ;;  %v124_v22 = vadd.f32 1.0, %v905_v16  ;;  %649 = vrcp.f32 %v122_v13  ;;  %v934_v39 = vsel %vm1316_vm1, 1.0, %v1318_v19  ;;  %vm138_vm10 = vcmp.ge.f32.partialorder %v804_v2, 0.0 }
  0x3d   :  { %v923_v25 = vpop.eup %641  ;;  %v125_v26 = vadd.f32 1.0, %v917_v21  ;;  %651 = vrcp.f32 %v123_v17  ;;  %vm139_vm11 = vcmp.ge.f32.partialorder %v806_v3, 0.0  ;;  %v199_v41 = vand.u32 2147483647, %v870_v58 }
  0x3e   :  { %v926_v33 = vpop.eup %643  ;;  %v126_v35 = vadd.f32 1.0, %v923_v25  ;;  %653 = vrcp.f32 %v124_v22  ;;  %v206_v42 = vadd.f32 1.0, %v205_v24  ;;  %vm140_vm12 = vcmp.ge.f32.partialorder %v808_v4, 0.0 }
  0x3f   :  { %v127_v40 = vadd.f32 1.0, %v926_v33  ;;  %655 = vrcp.f32 %v125_v26  ;;  %v215_v43 = vadd.f32 1.0, %v214_v36  ;;  %v223_v45 = vmul.f32 -0.5, %v905_v16 }
  0x40   :  { %657 = vrcp.f32 %v126_v35  ;;  %v945_v46 = vsel %vm1315_vm2, 1.0, %v1318_v19  ;;  %vm141_vm13 = vcmp.ge.f32.partialorder %v810_v5, 0.0  ;;  %v949_v47 = vmul.f32 %v862_v54, %v188_v27 }
  0x41   :  { %659 = vrcp.f32 %v127_v40  ;;  %v952_v48 = vmul.f32 %v870_v58, %v197_v29  ;;  %v232_v49 = vmul.f32 -0.5, %v917_v21  ;;  %vm142_vm14 = vcmp.ge.f32.partialorder %v815_v9, 0.0 }
  0x42   :  { %661 = vlog2.f32 %v120_v59  ;;  %v208_v50 = vand.u32 2147483647, %v885_v63  ;;  %v217_v51 = vand.u32 2147483647, %v894_v12  ;;  %v224_v52 = vadd.f32 1.0, %v223_v45 }
  0x43   :  { %663 = vlog2.f32 %v121_v6  ;;  %v960_v53 = vmul.f32 %v885_v63, %v206_v42  ;;  %v233_v55 = vadd.f32 1.0, %v232_v49  ;;  %v241_v56 = vmul.f32 -0.5, %v923_v25 }
  0x44   :  { %v646_v8 = vpop.eup %645  ;;  %vm963_vm2 = vcmp.lt.f32.partialorder %v190_v23, 0.0004427343  ;;  %665 = vlog2.f32 %v122_v13  ;;  %v968_v59 = vmul.f32 %v894_v12, %v215_v43  ;;  %v226_v24 = vand.u32 2147483647, %v905_v16 }
  0x45   :  { %v235_v27 = vand.u32 2147483647, %v917_v21  ;;  %v648_v6 = vpop.eup %647  ;;  %v144_v29 = vmul.f32 %v646_v8, %v862_v54  ;;  %vm973_vm1 = vcmp.lt.f32.partialorder %v199_v41, 0.0004427343  ;;  %667 = vlog2.f32 %v123_v17 }
  0x46   :  { %v978_v23 = vmul.f32 %v905_v16, %v224_v52  ;;  %v242_v42 = vadd.f32 1.0, %v241_v56  ;;  %v650_v13 = vpop.eup %649  ;;  %v145_v43 = vmul.f32 %v648_v6, %v870_v58  ;;  %vm981_vm0 = vcmp.lt.f32.partialorder %v208_v50, 0.0004427343 }
  0x47   :  { %669 = vlog2.f32 %v124_v22  ;;  %v244_v49 = vand.u32 2147483647, %v923_v25  ;;  %v250_v54 = vmul.f32 -0.5, %v926_v33  ;;  %v652_v41 = vpop.eup %651  ;;  %v146_v19 = vmul.f32 %v650_v13, %v885_v63 }
  0x48   :  { %v990_v17 = vsel %vm136_vm8, %v646_v8, %v144_v29  ;;  %vm992_vm15 = vcmp.lt.f32.partialorder %v217_v51, 0.0004427343  ;;  %671 = vlog2.f32 %v125_v26  ;;  %v997_v58 = vmul.f32 %v917_v21, %v233_v55  ;;  %v654_v22 = vpop.eup %653 }
  0x49   :  { %v147_v50 = vmul.f32 %v652_v41, %v894_v12  ;;  %vm1000_vm7 = vcmp.lt.f32.partialorder %v226_v24, 0.0004427343  ;;  %673 = vlog2.f32 %v126_v35  ;;  %v1005_v0 = vmul.f32 %v923_v25, %v242_v42  ;;  %v656_v51 = vpop.eup %655 }
  0x4a   :  { %v251_v63 = vadd.f32 1.0, %v250_v54  ;;  %v148_v8 = vmul.f32 %v654_v22, %v905_v16  ;;  %v1010_v26 = vsel %vm137_vm9, %v648_v6, %v145_v43  ;;  %vm1012_vm8 = vcmp.lt.f32.partialorder %v235_v27, 0.0004427343  ;;  %v658_v24 = vpop.eup %657 }
  0x4b   :  { %675 = vlog2.f32 %v127_v40  ;;  %v253_v12 = vand.u32 2147483647, %v926_v33  ;;  %v149_v35 = vmul.f32 %v656_v51, %v917_v21  ;;  %v1020_v29 = vsel %vm138_vm10, %v650_v13, %v146_v19  ;;  %v660_v40 = vpop.eup %659 }
  0x4c   :  { %v1024_v16 = vsel %vm139_vm11, %v652_v41, %v147_v50  ;;  %vm1026_vm9 = vcmp.lt.f32.partialorder %v244_v49, 0.0004427343  ;;  %v1031_v27 = vmul.f32 %v926_v33, %v251_v63  ;;  %v150_v6 = vmul.f32 %v658_v24, %v923_v25  ;;  %v662_v42 = vpop.eup %661 }
  0x4d   :  { %v1036_v21 = vsel %vm140_vm12, %v654_v22, %v148_v8  ;;  %vm1038_vm10 = vcmp.lt.f32.partialorder %v253_v12, 0.0004427343  ;;  %v1337_v3 = vmov 0.0   ;;  %v151_v13 = vmul.f32 %v660_v40, %v926_v33  ;;  %v664_v49 = vpop.eup %663 }
  0x4e   :  { %v1045_v19 = vsel %vm83_vm3, 1.0, %v1337_v3  ;;  %v1050_v43 = vsel %vm141_vm13, %v656_v51, %v149_v35  ;;  %v1055_v4 = vsel %vm84_vm4, 1.0, %v1337_v3  ;;  %v1060_v25 = vsel %vm85_vm5, 1.0, %v1337_v3  ;;  %v666_v22 = vpop.eup %665 }
  0x4f   :  { %v1064_v54 = vsel %vm142_vm14, %v658_v24, %v150_v6  ;;  %v186_v33 = vmul.f32 0.6931472, %v662_v42  ;;  %v1069_v5 = vsel %vm86_vm6, 1.0, %v1337_v3  ;;  %vm1338_vm11 = vcmp.ne.f32.partialorder %v852_v44, 0.0  ;;  %v668_v8 = vpop.eup %667 }
  0x50   :  { %v1074_v41 = vsel %vm1338_vm11, 1.0, %v1337_v3  ;;  %vm1339_vm12 = vcmp.ge.f32.partialorder %v817_v10, 0.0  ;;  %v195_v63 = vmul.f32 0.6931472, %v664_v49  ;;  %vm1340_vm13 = vcmp.ne.f32.partialorder %v832_v28, 0.0 }
  0x51   :  { %v1078_v50 = vsel %vm1339_vm12, %v660_v40, %v151_v13  ;;  %v272_v9 = vsel %vm1340_vm13, %v990_v17, 0.0  ;;  %vm1341_vm14 = vcmp.ne.f32.partialorder %v834_v30, 0.0  ;;  %v192_v12 = vsel %vm963_vm2, %v949_v47, %v186_v33  ;;  %v670_v28 = vpop.eup %669 }
  0x52   :  { %v273_v51 = vsel %vm1341_vm14, %v1010_v26, 0.0  ;;  %v204_v24 = vmul.f32 0.6931472, %v666_v22  ;;  %vm1342_vm11 = vcmp.ne.f32.partialorder %v836_v31, 0.0  ;;  %v275_v35 = vsel %vm83_vm3, %v1024_v16, 0.0  ;;  %v672_v11 = vpop.eup %671 }
  0x53   :  { %v274_v10 = vsel %vm1342_vm11, %v1020_v29, 0.0  ;;  %v201_v30 = vsel %vm973_vm1, %v952_v48, %v195_v63  ;;  %v213_v40 = vmul.f32 0.6931472, %v668_v8  ;;  %v1099_v6 = vadd.f32 %v192_v12, %v868_v57  ;;  %v674_v36 = vpop.eup %673 }
  0x54   :  { %v276_v47 = vsel %vm84_vm4, %v1036_v21, 0.0  ;;  %v210_v31 = vsel %vm981_vm0, %v960_v53, %v204_v24  ;;  %v222_v32 = vmul.f32 0.6931472, %v670_v28  ;;  %v1108_v3 = vadd.f32 %v201_v30, %v875_v60 }
  0x55   :  { %v277_v48 = vsel %vm85_vm5, %v1050_v43, 0.0  ;;  %v219_v57 = vsel %vm992_vm15, %v968_v59, %v213_v40  ;;  %v231_v34 = vmul.f32 0.6931472, %v672_v11  ;;  %v1117_v42 = vadd.f32 %v210_v31, %v879_v61  ;;  %v676_v45 = vpop.eup %675 }
  0x56   :  { %v278_v53 = vsel %vm86_vm6, %v1064_v54, 0.0  ;;  %v228_v60 = vsel %vm1000_vm7, %v978_v23, %v222_v32  ;;  %v240_v37 = vmul.f32 0.6931472, %v674_v36  ;;  %vm1343_vm0 = vcmp.ne.f32.partialorder %v852_v44, 0.0 }
  0x57   :  { %v279_v13 = vsel %vm1343_vm0, %v1078_v50, 0.0  ;;  %v280_v52 = vrot.slane %v272_v9, 4  ;;  %v237_v61 = vsel %vm1012_vm8, %v997_v58, %v231_v34  ;;  %v249_v59 = vmul.f32 0.6931472, %v676_v45 }
  0x58   :  { %v1132_v49 = vadd.f32 %v219_v57, %v883_v62  ;;  %v286_v38 = vrot.slane %v273_v51, 4  ;;  %v246_v56 = vsel %vm1026_vm9, %v1005_v0, %v240_v37  ;;  %v1138_v23 = vadd.f32 %v228_v60, %v890_v7 }
  0x59   :  { %v281_v33 = vadd.f32 %v280_v52, %v272_v9  ;;  %v292_v44 = vrot.slane %v274_v10, 4  ;;  %v255_v22 = vsel %vm1038_vm10, %v1031_v27, %v249_v59  ;;  %v1144_v58 = vadd.f32 %v237_v61, %v899_v14 }
  0x5a   :  { %v287_v55 = vadd.f32 %v286_v38, %v273_v51  ;;  %v298_v62 = vrot.slane %v275_v35, 4  ;;  %v1147_v63 = vadd.f32 %v246_v56, %v903_v15  ;;  %v304_v0 = vrot.slane %v276_v47, 4 }
  0x5b   :  { %v282_v8 = vrot.slane %v281_v33, 2  ;;  %v293_v1 = vadd.f32 %v292_v44, %v274_v10  ;;  %v310_v24 = vrot.slane %v277_v48, 4  ;;  %v316_v9 = vrot.slane %v278_v53, 4 }
  0x5c   :  { %v288_v12 = vrot.slane %v287_v55, 2  ;;  %v299_v7 = vadd.f32 %v298_v62, %v275_v35  ;;  %v305_v40 = vadd.f32 %v304_v0, %v276_v47  ;;  %v322_v2 = vrot.slane %v279_v13, 4 }
  0x5d   :  { %v283_v28 = vadd.f32 %v282_v8, %v281_v33  ;;  %v294_v30 = vrot.slane %v293_v1, 2  ;;  %v311_v14 = vadd.f32 %v310_v24, %v277_v48  ;;  %v317_v31 = vadd.f32 %v316_v9, %v278_v53 }
  0x5e   :  { %v289_v27 = vadd.f32 %v288_v12, %v287_v55  ;;  %v300_v11 = vrot.slane %v299_v7, 2  ;;  %v306_v36 = vrot.slane %v305_v40, 2  ;;  %v323_v15 = vadd.f32 %v322_v2, %v279_v13 }
  0x5f   :  { %v284_v51 = vrot.slane %v283_v28, 1  ;;  %v295_v32 = vadd.f32 %v294_v30, %v293_v1  ;;  %v312_v10 = vrot.slane %v311_v14, 2  ;;  %v318_v45 = vrot.slane %v317_v31, 2 }
  0x60   :  { %v290_v57 = vrot.slane %v289_v27, 1  ;;  %v301_v34 = vadd.f32 %v300_v11, %v299_v7  ;;  %v1150_v35 = vadd.f32 %v255_v22, %v910_v18  ;;  %v307_v37 = vadd.f32 %v306_v36, %v305_v40 }
  0x61   :  { %v296_v60 = vrot.slane %v295_v32, 1  ;;  %v324_v52 = vrot.slane %v323_v15, 2  ;;  %v1152_v47 = vadd.f32 %v284_v51, %v283_v28  ;;  %v313_v59 = vadd.f32 %v312_v10, %v311_v14 }
  0x62   :  { %v302_v61 = vrot.slane %v301_v34, 1  ;;  %v319_v48 = vadd.f32 %v318_v45, %v317_v31  ;;  %v1154_v53 = vadd.f32 %v290_v57, %v289_v27  ;;  %v308_v38 = vrot.slane %v307_v37, 1 }
  0x63   :  { %v325_v56 = vadd.f32 %v324_v52, %v323_v15  ;;  %v336_v13 = vrot.slane %v990_v17, 4  ;;  %v1157_v33 = vadd.f32 %v296_v60, %v295_v32  ;;  %v314_v44 = vrot.slane %v313_v59, 1 }
  0x64   :  { %v320_v55 = vrot.slane %v319_v48, 1  ;;  %v342_v18 = vrot.slane %v1010_v26, 4  ;;  %v1160_v22 = vadd.f32 %v302_v61, %v301_v34  ;;  %v1162_v62 = vadd.f32 %v308_v38, %v307_v37 }
  0x65   :  { %v337_v8 = vadd.f32 %v336_v13, %v990_v17  ;;  %v348_v1 = vrot.slane %v1020_v29, 4  ;;  %v1166_v0 = vadd.f32 %v314_v44, %v313_v59  ;;  %v326_v12 = vrot.slane %v325_v56, 1 }
  0x66   :  { %v343_v7 = vadd.f32 %v342_v18, %v1010_v26  ;;  %v354_v24 = vrot.slane %v1024_v16, 4  ;;  %v1170_v9 = vadd.f32 %v320_v55, %v319_v48  ;;  %v360_v40 = vrot.slane %v1036_v21, 4 }
  0x67   :  { %v338_v28 = vrot.slane %v337_v8, 2  ;;  %v349_v30 = vadd.f32 %v348_v1, %v1020_v29  ;;  %v366_v17 = vrot.slane %v1050_v43, 4  ;;  %v372_v11 = vrot.slane %v1064_v54, 4 }
  0x68   :  { %v344_v2 = vrot.slane %v343_v7, 2  ;;  %v355_v27 = vadd.f32 %v354_v24, %v1024_v16  ;;  %v361_v26 = vadd.f32 %v360_v40, %v1036_v21  ;;  %v378_v51 = vrot.slane %v1078_v50, 4 }
  0x69   :  { %v339_v14 = vadd.f32 %v338_v28, %v337_v8  ;;  %v350_v31 = vrot.slane %v349_v30, 2  ;;  %v367_v15 = vadd.f32 %v366_v17, %v1050_v43  ;;  %v373_v29 = vadd.f32 %v372_v11, %v1064_v54 }
  0x6a   :  { %v345_v32 = vadd.f32 %v344_v2, %v343_v7  ;;  %v356_v36 = vrot.slane %v355_v27, 2  ;;  %v362_v10 = vrot.slane %v361_v26, 2  ;;  %v379_v16 = vadd.f32 %v378_v51, %v1078_v50 }
  0x6b   :  { %v340_v57 = vrot.slane %v339_v14, 1  ;;  %v351_v34 = vadd.f32 %v350_v31, %v349_v30  ;;  %v368_v37 = vrot.slane %v367_v15, 2  ;;  %v374_v52 = vrot.slane %v373_v29, 2 }
  0x6c   :  { %v346_v45 = vrot.slane %v345_v32, 1  ;;  %v357_v60 = vadd.f32 %v356_v36, %v355_v27  ;;  %v1182_v61 = vadd.f32 %v326_v12, %v325_v56  ;;  %v363_v59 = vadd.f32 %v362_v10, %v361_v26 }
  0x6d   :  { %v352_v21 = vrot.slane %v351_v34, 1  ;;  %v380_v48 = vrot.slane %v379_v16, 2  ;;  %v1184_v38 = vadd.f32 %v340_v57, %v339_v14  ;;  %v369_v43 = vadd.f32 %v368_v37, %v367_v15 }
  0x6e   :  { %v358_v13 = vrot.slane %v357_v60, 1  ;;  %v375_v44 = vadd.f32 %v374_v52, %v373_v29  ;;  %v1186_v54 = vadd.f32 %v346_v45, %v345_v32  ;;  %v364_v55 = vrot.slane %v363_v59, 1 }
  0x6f   :  { %v381_v18 = vadd.f32 %v380_v48, %v379_v16  ;;  %v392_v50 = vrot.slane %v915_v20, 4  ;;  %v1189_v8 = vadd.f32 %v352_v21, %v351_v34  ;;  %v370_v1 = vrot.slane %v369_v43, 1 }
  0x70   :  { %v376_v7 = vrot.slane %v375_v44, 1  ;;  %v398_v56 = vrot.slane %v934_v39, 4  ;;  %v1192_v12 = vadd.f32 %v358_v13, %v357_v60  ;;  %v1194_v24 = vadd.f32 %v364_v55, %v363_v59 }
  0x71   :  { %v393_v28 = vadd.f32 %v392_v50, %v915_v20  ;;  %v404_v30 = vrot.slane %v945_v46, 4  ;;  %v1198_v40 = vadd.f32 %v370_v1, %v369_v43  ;;  %v382_v2 = vrot.slane %v381_v18, 1 }
  0x72   :  { %v399_v27 = vadd.f32 %v398_v56, %v934_v39  ;;  %v410_v17 = vrot.slane %v1045_v19, 4  ;;  %v1202_v11 = vadd.f32 %v376_v7, %v375_v44  ;;  %v416_v26 = vrot.slane %v1055_v4, 4 }
  0x73   :  { %v394_v14 = vrot.slane %v393_v28, 2  ;;  %v405_v31 = vadd.f32 %v404_v30, %v945_v46  ;;  %v422_v20 = vrot.slane %v1060_v25, 4  ;;  %v428_v36 = vrot.slane %v1069_v5, 4 }
  0x74   :  { %v400_v51 = vrot.slane %v399_v27, 2  ;;  %v411_v32 = vadd.f32 %v410_v17, %v1045_v19  ;;  %v417_v39 = vadd.f32 %v416_v26, %v1055_v4  ;;  %v434_v57 = vrot.slane %v1074_v41, 4 }
  0x75   :  { %v395_v15 = vadd.f32 %v394_v14, %v393_v28  ;;  %v406_v29 = vrot.slane %v405_v31, 2  ;;  %v423_v16 = vadd.f32 %v422_v20, %v1060_v25  ;;  %v429_v46 = vadd.f32 %v428_v36, %v1069_v5 }
  0x76   :  { %v401_v34 = vadd.f32 %v400_v51, %v399_v27  ;;  %v412_v10 = vrot.slane %v411_v32, 2  ;;  %v418_v37 = vrot.slane %v417_v39, 2  ;;  %v435_v19 = vadd.f32 %v434_v57, %v1074_v41 }
  0x77   :  { %v396_v45 = vrot.slane %v395_v15, 1  ;;  %v407_v60 = vadd.f32 %v406_v29, %v405_v31  ;;  %v424_v59 = vrot.slane %v423_v16, 2  ;;  %v430_v48 = vrot.slane %v429_v46, 2 }
  0x78   :  { %v402_v52 = vrot.slane %v401_v34, 1  ;;  %v413_v21 = vadd.f32 %v412_v10, %v411_v32  ;;  %v1214_v13 = vadd.f32 %v382_v2, %v381_v18  ;;  %v419_v43 = vadd.f32 %v418_v37, %v417_v39 }
  0x79   :  { %v408_v4 = vrot.slane %v407_v60, 1  ;;  %v436_v44 = vrot.slane %v435_v19, 2  ;;  %v1216_v55 = vadd.f32 %v396_v45, %v395_v15  ;;  %v425_v25 = vadd.f32 %v424_v59, %v423_v16 }
  0x7a   :  { %v414_v50 = vrot.slane %v413_v21, 1  ;;  %v431_v1 = vadd.f32 %v430_v48, %v429_v46  ;;  %v1218_v5 = vadd.f32 %v402_v52, %v401_v34  ;;  %v420_v7 = vrot.slane %v419_v43, 1 }
  0x7b   :  { %v437_v56 = vadd.f32 %v436_v44, %v435_v19  ;;  %v448_v41 = vrot.slane %v1099_v6, 4  ;;  %v1221_v28 = vadd.f32 %v408_v4, %v407_v60  ;;  %v426_v30 = vrot.slane %v425_v25, 1 }
  0x7c   :  { %v432_v27 = vrot.slane %v431_v1, 1  ;;  %v454_v18 = vrot.slane %v1108_v3, 4  ;;  %vm513_vm1 = vcmask 1041409   ;;  %v1224_v2 = vadd.f32 %v414_v50, %v413_v21 }
  0x7d   :  { %v1226_v17 = vadd.f32 %v420_v7, %v419_v43  ;;  %v449_v14 = vadd.f32 %v448_v41, %v1099_v6  ;;  %v460_v31 = vrot.slane %v1117_v42, 4  ;;  %vm515_vm2 = vcmask 1042434  }
  0x7e   :  { %v1230_v26 = vadd.f32 %v426_v30, %v425_v25  ;;  %v438_v51 = vrot.slane %v437_v56, 1  ;;  %v455_v32 = vadd.f32 %v454_v18, %v1108_v3  ;;  %v466_v20 = vrot.slane %v1132_v49, 4 }
  0x7f   :  { %vm517_vm3 = vcmask 1043459   ;;  %v1234_v36 = vadd.f32 %v432_v27, %v431_v1  ;;  %v450_v15 = vrot.slane %v449_v14, 2  ;;  %v461_v29 = vadd.f32 %v460_v31, %v1117_v42 }
  0x80   :  { %v472_v39 = vrot.slane %v1138_v23, 4  ;;  %vm519_vm4 = vcmask 1044484   ;;  %v456_v6 = vrot.slane %v455_v32, 2  ;;  %v467_v57 = vadd.f32 %v466_v20, %v1132_v49 }
  0x81   :  { %v478_v34 = vrot.slane %v1144_v58, 4  ;;  %v484_v10 = vrot.slane %v1147_v63, 4  ;;  %vm521_vm5 = vcmask 1045509   ;;  %v451_v3 = vadd.f32 %v450_v15, %v449_v14 }
  0x82   :  { %v462_v16 = vrot.slane %v461_v29, 2  ;;  %v473_v46 = vadd.f32 %v472_v39, %v1138_v23  ;;  %v490_v45 = vrot.slane %v1150_v35, 4  ;;  %vm523_vm6 = vcmask 1046534  }
  0x83   :  { %v457_v60 = vadd.f32 %v456_v6, %v455_v32  ;;  %v468_v42 = vrot.slane %v467_v57, 2  ;;  %v479_v37 = vadd.f32 %v478_v34, %v1144_v58  ;;  %v485_v19 = vadd.f32 %v484_v10, %v1147_v63 }
  0x84   :  { %vm525_vm7 = vcmask 1047559   ;;  %v452_v49 = vrot.slane %v451_v3, 1  ;;  %v463_v52 = vadd.f32 %v462_v16, %v461_v29  ;;  %v474_v21 = vrot.slane %v473_v46, 2 }
  0x85   :  { %v491_v59 = vadd.f32 %v490_v45, %v1150_v35  ;;  %v458_v48 = vrot.slane %v457_v60, 1  ;;  %v469_v4 = vadd.f32 %v468_v42, %v467_v57  ;;  %v480_v43 = vrot.slane %v479_v37, 2 }
  0x86   :  { %v486_v44 = vrot.slane %v485_v19, 2  ;;  %v439_v23 = vadd.f32 %v438_v51, %v437_v56  ;;  %v464_v50 = vrot.slane %v463_v52, 1  ;;  %v475_v25 = vadd.f32 %v474_v21, %v473_v46 }
  0x87   :  { %v492_v1 = vrot.slane %v491_v59, 2  ;;  %v453_v7 = vadd.f32 %v452_v49, %v451_v3  ;;  %v470_v41 = vrot.slane %v469_v4, 1  ;;  %v481_v30 = vadd.f32 %v480_v43, %v479_v37 }
  0x88   :  { %v487_v58 = vadd.f32 %v486_v44, %v485_v19  ;;  %v459_v27 = vadd.f32 %v458_v48, %v457_v60  ;;  %v476_v63 = vrot.slane %v475_v25, 1  ;;  %v514_v14 = vsel %vm513_vm1, %v1154_v53, %v1152_v47 }
  0x89   :  { %v493_v18 = vadd.f32 %v492_v1, %v491_v59  ;;  %v465_v35 = vadd.f32 %v464_v50, %v463_v52  ;;  %v482_v31 = vrot.slane %v481_v30, 1  ;;  %v516_v56 = vsel %vm515_vm2, %v1157_v33, %v514_v14 }
  0x8a   :  { %v488_v32 = vrot.slane %v487_v58, 1  ;;  %v471_v51 = vadd.f32 %v470_v41, %v469_v4  ;;  %v477_v20 = vadd.f32 %v476_v63, %v475_v25  ;;  %v518_v15 = vsel %vm517_vm3, %v1160_v22, %v516_v56 }
  0x8b   :  { %v540_v29 = vsel %vm513_vm1, %v1186_v54, %v1184_v38  ;;  %v483_v39 = vadd.f32 %v482_v31, %v481_v30  ;;  %v494_v6 = vrot.slane %v493_v18, 1  ;;  %v520_v47 = vsel %vm519_vm4, %v1162_v62, %v518_v15 }
  0x8c   :  { %v541_v53 = vsel %vm515_vm2, %v1189_v8, %v540_v29  ;;  %v489_v57 = vadd.f32 %v488_v32, %v487_v58  ;;  %v522_v33 = vsel %vm521_vm5, %v1166_v0, %v520_v47  ;;  %v560_v22 = vsel %vm513_vm1, %v1218_v5, %v1216_v55 }
  0x8d   :  { %v542_v34 = vsel %vm517_vm3, %v1192_v12, %v541_v53  ;;  %v524_v38 = vsel %vm523_vm6, %v1170_v9, %v522_v33  ;;  %v561_v54 = vsel %vm515_vm2, %v1221_v28, %v560_v22  ;;  %v580_v8 = vsel %vm513_vm1, %v459_v27, %v453_v7 }
  0x8e   :  { %v543_v62 = vsel %vm519_vm4, %v1194_v24, %v542_v34  ;;  %v526_v0 = vsel %vm525_vm7, %v1182_v61, %v524_v38  ;;  %v562_v55 = vsel %vm517_vm3, %v1224_v2, %v561_v54  ;;  %v581_v5 = vsel %vm515_vm2, %v465_v35, %v580_v8 }
  0x8f   :  { %v544_v12 = vsel %vm521_vm5, %v1198_v40, %v543_v62  ;;  %v495_v9 = vadd.f32 %v494_v6, %v493_v18  ;;  %v563_v28 = vsel %vm519_vm4, %v1226_v17, %v562_v55  ;;  %v582_v10 = vsel %vm517_vm3, %v471_v51, %v581_v5  ;;  %597 = vst [vmem:[#allocation8] sm:$0xff] %v526_v0 }
  0x90   :  { %v545_v24 = vsel %vm523_vm6, %v1202_v11, %v544_v12  ;;  %v564_v40 = vsel %vm521_vm5, %v1230_v26, %v563_v28  ;;  %v583_v2 = vsel %vm519_vm4, %v477_v20, %v582_v10 }
  0x91   :  { %v546_v61 = vsel %vm525_vm7, %v1214_v13, %v545_v24  ;;  %v565_v3 = vsel %vm523_vm6, %v1234_v36, %v564_v40  ;;  %v584_v11 = vsel %vm521_vm5, %v483_v39, %v583_v2 }
  0x92   :  { %598 = vst [vmem:[#allocation8 + $0x8] sm:$0xff] %v546_v61  ;;  %v566_v17 = vsel %vm525_vm7, %v439_v23, %v565_v3  ;;  %v585_v16 = vsel %vm523_vm6, %v489_v57, %v584_v11 }
  0x93   :  { %v586_v46 = vsel %vm525_vm7, %v495_v9, %v585_v16  ;;  %599 = vst [vmem:[#allocation8 + $0x10] sm:$0xff] %v566_v17 }
  0x94   :  { %600 = vst [vmem:[#allocation8 + $0x18] sm:$0xff] %v586_v46 }
  0x95   :  { %732 = shalt.err (!%p729_p6)
}
  0x96   :  { %s733_s10 = scalar_lea.hbm %s1314_s2, 512 }
  0x97   :  { %p734_p7 = scmp.ne.s32.totalorder %s1314_s2, %s733_s10  ;;  %p737_p8 = scmp.lt.u32.totalorder %s733_s10, %s1314_s2 }
  0x99   :  { %p739_p9 = pnand %p737_p8, %p734_p7 }
  0x9b   :  { %742 = shalt.err (!%p739_p9)
}
  0x9c   :  { %612 = dma.vmem_to_hbm [thread:$0]  %s607_s6, 512, %s1314_s2, [#allocation5], %s750_s19, %s750_s19, %s751_s20  }
  0x9d   :  { %747 = dma.done.wait [#allocation5], 512  }
  0x9e   :  { %748 = vsyncadd [#allocation5], 4294966784 }
  0x9f   :  { %616 = vsyncpa [#allocation4], 1 }
  0xa0   :  { %617 = vsyncpa [#allocation7], 1 }
  0xa1   :  { %618 = vsyncpa [#allocation5], 1 }

</bundles_post_ra>
